<compile_context>
chip_gen: v5e
topology: v5e:2x2
jax: 0.10.0
libtpu: 0.0.40
codegen_flags: <defaults>
</compile_context>

<pallas_src>
import functools
import math

import jax
import jax.numpy as jnp
from jax.experimental import pallas as pl
from jax.experimental.pallas import tpu as pltpu


def block_kernel(*refs, cout, odd_cols, count, use_batch_norm, apply_relu, eps,
                 has_odd):
    """Fused polyphase upsample-conv + BatchNorm (batch stats) + ReLU.

    Refs (whole arrays resident in VMEM, single invocation, no grid):
      se_ref : (KE*Cin, N*LE)  even-phase im2col slab (MXU dtype)
      we_ref : (Cout, KE*Cin)  even-tap weights       (MXU dtype)
      [so_ref: (KO*Cin, N*LO)  odd-phase slab      -- only if K >= 2]
      [wo_ref: (Cout, KO*Cin)  odd-tap weights     -- only if K >= 2]
      BN on : gamma (Cout,1) f32, beta (Cout,1) f32
      BN off: bias  (Cout,1) f32
      oe_ref: (Cout, N*LE) f32  even-phase output
      oo_ref: (Cout, N*LO) f32  odd-phase output
    """
    it = iter(refs)
    se_ref = next(it)
    we_ref = next(it)
    so_ref = next(it) if has_odd else None
    wo_ref = next(it) if has_odd else None
    if use_batch_norm:
        gamma_ref = next(it)
        beta_ref = next(it)
    else:
        bias_ref = next(it)
    oe_ref = next(it)
    oo_ref = next(it)

    # One MXU contraction per phase: all taps+channels collapsed into the
    # contraction dim, all batches+time positions along lanes. f32 accumulate.
    y_e = jnp.dot(we_ref[...], se_ref[...], preferred_element_type=jnp.float32)
    if has_odd:
        y_o = jnp.dot(wo_ref[...], so_ref[...], preferred_element_type=jnp.float32)
    else:
        # K == 1: every odd output sample of the zero-stuffed conv is exactly 0.
        y_o = jnp.zeros((cout, odd_cols), dtype=jnp.float32)

    if use_batch_norm:
        # Conv bias cancels exactly under training-mode BN -> never added.
        inv_n = 1.0 / count
        mean = (jnp.sum(y_e, axis=1, keepdims=True)
                + jnp.sum(y_o, axis=1, keepdims=True)) * inv_n
        # Center in place: only two full-size f32 slabs stay live.
        y_e = y_e - mean
        y_o = y_o - mean
        var = (jnp.sum(y_e * y_e, axis=1, keepdims=True)
               + jnp.sum(y_o * y_o, axis=1, keepdims=True)) * inv_n
        scale = gamma_ref[...] * jax.lax.rsqrt(var + eps)     # (Cout, 1)
        y_e = y_e * scale + beta_ref[...]
        y_o = y_o * scale + beta_ref[...]
    else:
        y_e = y_e + bias_ref[...]
        y_o = y_o + bias_ref[...]

    if apply_relu:
        y_e = jnp.maximum(y_e, 0.0)
        y_o = jnp.maximum(y_o, 0.0)

    oe_ref[...] = y_e
    oo_ref[...] = y_o


@functools.partial(jax.jit,
                   static_argnames=("use_batch_norm", "apply_relu", "eps", "mxu_dtype"))
def block_forward(x, w, b, gamma, beta, *, use_batch_norm=True, apply_relu=True,
                  eps=1e-5, mxu_dtype=jnp.bfloat16):
    """x: (N, Cin, T), w: (Cout, Cin, K), b/gamma/beta: (Cout,) -> (N, Cout, 2T-K+1)."""
    N, Cin, T = x.shape
    Cout, _, K = w.shape
    Lout = 2 * T - K + 1
    assert Lout >= 2, "degenerate output length"
    KE, KO = (K + 1) // 2, K // 2
    LE, LO = (Lout + 1) // 2, Lout // 2

    # ---- wrapper-side layout plumbing (im2col per phase; no in-kernel slicing) ----
    xf = x.astype(jnp.float32)

    def phase_slab(offset, ntaps, length):
        # rows: tap-major / channel-minor ; cols: batch-major / time-minor.
        taps = [jnp.transpose(xf[:, :, offset + q: offset + q + length], (1, 0, 2))
                for q in range(ntaps)]                      # each (Cin, N, length)
        return jnp.stack(taps, axis=0).reshape(ntaps * Cin, N * length)

    slab_e = phase_slab(0, KE, LE).astype(mxu_dtype)
    w_e = jnp.transpose(w[:, :, 0::2], (0, 2, 1)).reshape(Cout, KE * Cin).astype(mxu_dtype)
    args = [slab_e, w_e]
    if KO > 0:
        slab_o = phase_slab(1, KO, LO).astype(mxu_dtype)
        w_o = jnp.transpose(w[:, :, 1::2], (0, 2, 1)).reshape(Cout, KO * Cin).astype(mxu_dtype)
        args += [slab_o, w_o]
    if use_batch_norm:
        # Conv bias is dropped (it cancels exactly in training-mode BN).
        args += [gamma.reshape(Cout, 1).astype(jnp.float32),
                 beta.reshape(Cout, 1).astype(jnp.float32)]
    else:
        args.append(b.reshape(Cout, 1).astype(jnp.float32))

    out_shapes = (jax.ShapeDtypeStruct((Cout, N * LE), jnp.float32),
                  jax.ShapeDtypeStruct((Cout, N * LO), jnp.float32))

    # Size the scoped VMEM limit from the actual buffers (v5e default is only 16 MiB).
    total_bytes = sum(int(a.size) * a.dtype.itemsize for a in args)
    total_bytes += sum(int(math.prod(s.shape)) * 4 for s in out_shapes)
    vmem_limit = int(min(64 * 2 ** 20, max(32 * 2 ** 20, 4 * total_bytes)))

    kernel = functools.partial(
        block_kernel, cout=Cout, odd_cols=N * LO, count=float(N * Lout),
        use_batch_norm=use_batch_norm, apply_relu=apply_relu, eps=eps,
        has_odd=KO > 0)

    # No grid: single invocation, whole arrays in VMEM, no pointless double-buffering.
    out_e, out_o = pl.pallas_call(
        kernel,
        out_shape=out_shapes,
        compiler_params=pltpu.CompilerParams(vmem_limit_bytes=vmem_limit),
    )(*args)

    # ---- wrapper-side even/odd interleave (pure reshape/transpose, no compute) ----
    y_e = jnp.transpose(out_e.reshape(Cout, N, LE), (1, 0, 2))     # (N, Cout, LE)
    y_o = jnp.transpose(out_o.reshape(Cout, N, LO), (1, 0, 2))     # (N, Cout, LO)
    if LO < LE:                                                    # K even
        y_o = jnp.pad(y_o, ((0, 0), (0, 0), (0, LE - LO)))
    y = jnp.stack([y_e, y_o], axis=-1).reshape(N, Cout, 2 * LE)
    return y[:, :, :Lout]


def block_reference(x, w, b, gamma, beta, *,
                    use_batch_norm=True, apply_relu=True, eps=1e-5):
    """Plain-JAX reference matching the PyTorch forward (training-mode BN)."""
    N, Cin, T = x.shape
    x_up = jnp.zeros((N, Cin, 2 * T), x.dtype).at[:, :, ::2].set(x)
    y = jax.lax.conv_general_dilated(
        x_up, w, window_strides=(1,), padding="VALID",
        dimension_numbers=("NCH", "OIH", "NCH")) + b[None, :, None]
    if use_batch_norm:
        mean = y.mean(axis=(0, 2), keepdims=True)
        var = ((y - mean) ** 2).mean(axis=(0, 2), keepdims=True)
        y = (y - mean) / jnp.sqrt(var + eps) * gamma[None, :, None] + beta[None, :, None]
    if apply_relu:
        y = jnp.maximum(y, 0.0)
    return y


if __name__ == "__main__":
    # Small shapes consistent with the module: Conv1d(channels_in=4 -> channels_out=8, k=3)
    N, Cin, Cout, T, K = 2, 4, 8, 16, 3

    key = jax.random.PRNGKey(0)
    kx, kw, kb = jax.random.split(key, 3)
    bound = 1.0 / math.sqrt(Cin * K)         # PyTorch-style Conv1d init bounds
    x = jax.random.normal(kx, (N, Cin, T), jnp.float32)
    w = jax.random.uniform(kw, (Cout, Cin, K), jnp.float32, -bound, bound)
    b = jax.random.uniform(kb, (Cout,), jnp.float32, -bound, bound)
    gamma = jnp.ones((Cout,), jnp.float32)   # BatchNorm1d weight init
    beta = jnp.zeros((Cout,), jnp.float32)   # BatchNorm1d bias init

    Lout = 2 * T - K + 1
    ref = block_reference(x, w, b, gamma, beta, use_batch_norm=True, apply_relu=True)

    # Default fast path: bf16 MXU operands, f32 accumulation / BN / ReLU.
    out = jax.block_until_ready(block_forward(x, w, b, gamma, beta))
    assert out.shape == (N, Cout, Lout)
    assert jnp.allclose(out, ref, rtol=2e-2, atol=3e-2), \
        f"bf16 path max abs err {jnp.max(jnp.abs(out - ref))}"

    # f32-MXU path: exact forward semantics of the module at tight tolerance.
    out_f32 = jax.block_until_ready(
        block_forward(x, w, b, gamma, beta, mxu_dtype=jnp.float32))
    assert jnp.allclose(out_f32, ref, rtol=1e-4, atol=1e-4), \
        f"f32 path max abs err {jnp.max(jnp.abs(out_f32 - ref))}"

    # No-BN path (conv bias + ReLU only).
    ref2 = block_reference(x, w, b, gamma, beta, use_batch_norm=False, apply_relu=True)
    out2 = jax.block_until_ready(
        block_forward(x, w, b, gamma, beta, use_batch_norm=False))
    assert jnp.allclose(out2, ref2, rtol=2e-2, atol=3e-2), \
        f"no-BN path max abs err {jnp.max(jnp.abs(out2 - ref2))}"

    print("KERNEL_OK")
</pallas_src>

<mosaic_0001>
module attributes {stable_mosaic.version = 11 : i64} {
  func.func @block_kernel(%arg0: memref<8x30xbf16, #tpu.memory_space<vmem>>, %arg1: memref<8x8xbf16, #tpu.memory_space<vmem>>, %arg2: memref<4x30xbf16, #tpu.memory_space<vmem>>, %arg3: memref<8x4xbf16, #tpu.memory_space<vmem>>, %arg4: memref<8x1xf32, #tpu.memory_space<vmem>>, %arg5: memref<8x1xf32, #tpu.memory_space<vmem>>, %arg6: memref<8x30xf32, #tpu.memory_space<vmem>>, %arg7: memref<8x30xf32, #tpu.memory_space<vmem>>) attributes {dimension_semantics = [], scalar_prefetch = 0 : i64, scratch_operands = 0 : i64, tpu.core_type = #tpu.core_type<tc>} {
    %c0 = arith.constant 0 : index
    %c0_0 = arith.constant 0 : index
    %0 = vector.load %arg1[%c0, %c0_0] : memref<8x8xbf16, #tpu.memory_space<vmem>>, vector<8x8xbf16>
    %c0_1 = arith.constant 0 : index
    %c0_2 = arith.constant 0 : index
    %1 = vector.load %arg0[%c0_1, %c0_2] : memref<8x30xbf16, #tpu.memory_space<vmem>>, vector<8x30xbf16>
    %cst = arith.constant dense<0.000000e+00> : vector<8x30xf32>
    %2 = tpu.matmul %0, %1, %cst {dimension_numbers = #tpu.dot_dimension_numbers<[1], [0], [0], [1], [0, 0, 1, 1], [], []>} : vector<8x8xbf16>, vector<8x30xbf16>, vector<8x30xf32> -> vector<8x30xf32>
    %c0_3 = arith.constant 0 : index
    %c0_4 = arith.constant 0 : index
    %3 = vector.load %arg3[%c0_3, %c0_4] : memref<8x4xbf16, #tpu.memory_space<vmem>>, vector<8x4xbf16>
    %c0_5 = arith.constant 0 : index
    %c0_6 = arith.constant 0 : index
    %4 = vector.load %arg2[%c0_5, %c0_6] : memref<4x30xbf16, #tpu.memory_space<vmem>>, vector<4x30xbf16>
    %cst_7 = arith.constant dense<0.000000e+00> : vector<8x30xf32>
    %5 = tpu.matmul %3, %4, %cst_7 {dimension_numbers = #tpu.dot_dimension_numbers<[1], [0], [0], [1], [0, 0, 1, 1], [], []>} : vector<8x4xbf16>, vector<4x30xbf16>, vector<8x30xf32> -> vector<8x30xf32>
    %cst_8 = arith.constant dense<0.000000e+00> : vector<8xf32>
    %6 = vector.multi_reduction <add>, %2, %cst_8 [1] : vector<8x30xf32> to vector<8xf32>
    %7 = vector.shape_cast %6 : vector<8xf32> to vector<8x1xf32>
    %cst_9 = arith.constant dense<0.000000e+00> : vector<8xf32>
    %8 = vector.multi_reduction <add>, %5, %cst_9 [1] : vector<8x30xf32> to vector<8xf32>
    %9 = vector.shape_cast %8 : vector<8xf32> to vector<8x1xf32>
    %10 = arith.addf %7, %9 : vector<8x1xf32>
    %cst_10 = arith.constant 0.0166666675 : f32
    %11 = vector.broadcast %cst_10 : f32 to vector<8x1xf32>
    %12 = arith.mulf %10, %11 : vector<8x1xf32>
    %13 = vector.broadcast %12 : vector<8x1xf32> to vector<8x30xf32>
    %14 = arith.subf %2, %13 : vector<8x30xf32>
    %15 = vector.broadcast %12 : vector<8x1xf32> to vector<8x30xf32>
    %16 = arith.subf %5, %15 : vector<8x30xf32>
    %17 = arith.mulf %14, %14 : vector<8x30xf32>
    %cst_11 = arith.constant dense<0.000000e+00> : vector<8xf32>
    %18 = vector.multi_reduction <add>, %17, %cst_11 [1] : vector<8x30xf32> to vector<8xf32>
    %19 = vector.shape_cast %18 : vector<8xf32> to vector<8x1xf32>
    %20 = arith.mulf %16, %16 : vector<8x30xf32>
    %cst_12 = arith.constant dense<0.000000e+00> : vector<8xf32>
    %21 = vector.multi_reduction <add>, %20, %cst_12 [1] : vector<8x30xf32> to vector<8xf32>
    %22 = vector.shape_cast %21 : vector<8xf32> to vector<8x1xf32>
    %23 = arith.addf %19, %22 : vector<8x1xf32>
    %cst_13 = arith.constant 0.0166666675 : f32
    %24 = vector.broadcast %cst_13 : f32 to vector<8x1xf32>
    %25 = arith.mulf %23, %24 : vector<8x1xf32>
    %c0_14 = arith.constant 0 : index
    %c0_15 = arith.constant 0 : index
    %26 = vector.load %arg4[%c0_14, %c0_15] : memref<8x1xf32, #tpu.memory_space<vmem>>, vector<8x1xf32>
    %cst_16 = arith.constant 9.99999974E-6 : f32
    %27 = vector.broadcast %cst_16 : f32 to vector<8x1xf32>
    %28 = arith.addf %25, %27 : vector<8x1xf32>
    %29 = math.rsqrt %28 : vector<8x1xf32>
    %30 = arith.mulf %26, %29 : vector<8x1xf32>
    %31 = vector.broadcast %30 : vector<8x1xf32> to vector<8x30xf32>
    %32 = arith.mulf %14, %31 : vector<8x30xf32>
    %c0_17 = arith.constant 0 : index
    %c0_18 = arith.constant 0 : index
    %33 = vector.load %arg5[%c0_17, %c0_18] : memref<8x1xf32, #tpu.memory_space<vmem>>, vector<8x1xf32>
    %34 = vector.broadcast %33 : vector<8x1xf32> to vector<8x30xf32>
    %35 = arith.addf %32, %34 : vector<8x30xf32>
    %36 = vector.broadcast %30 : vector<8x1xf32> to vector<8x30xf32>
    %37 = arith.mulf %16, %36 : vector<8x30xf32>
    %c0_19 = arith.constant 0 : index
    %c0_20 = arith.constant 0 : index
    %38 = vector.load %arg5[%c0_19, %c0_20] : memref<8x1xf32, #tpu.memory_space<vmem>>, vector<8x1xf32>
    %39 = vector.broadcast %38 : vector<8x1xf32> to vector<8x30xf32>
    %40 = arith.addf %37, %39 : vector<8x30xf32>
    %cst_21 = arith.constant 0.000000e+00 : f32
    %41 = vector.broadcast %cst_21 : f32 to vector<8x30xf32>
    %42 = arith.maximumf %35, %41 : vector<8x30xf32>
    %cst_22 = arith.constant 0.000000e+00 : f32
    %43 = vector.broadcast %cst_22 : f32 to vector<8x30xf32>
    %44 = arith.maximumf %40, %43 : vector<8x30xf32>
    %c0_23 = arith.constant 0 : index
    %c0_24 = arith.constant 0 : index
    %45 = vector.load %arg6[%c0_23, %c0_24] : memref<8x30xf32, #tpu.memory_space<vmem>>, vector<8x30xf32>
    tpu.vector_store %arg6[%c0_23, %c0_24], %42 {strides = array<i32>} : memref<8x30xf32, #tpu.memory_space<vmem>>, vector<8x30xf32>,
    %c0_25 = arith.constant 0 : index
    %c0_26 = arith.constant 0 : index
    %46 = vector.load %arg7[%c0_25, %c0_26] : memref<8x30xf32, #tpu.memory_space<vmem>>, vector<8x30xf32>
    tpu.vector_store %arg7[%c0_25, %c0_26], %44 {strides = array<i32>} : memref<8x30xf32, #tpu.memory_space<vmem>>, vector<8x30xf32>,
    return
  }
}

</mosaic_0001>

<bundles_post_ra>
// kernel: block_forward.1
= control target key start
LH: loop header
LB: loop body
LE: loop exit
PB: predicated region body
PF: predicated region fallthrough
CT: control target
= control target key end

     0   :  { %vm32_vm0 = vcmask 1043456   ;;  %vm55_vm1 = vcmask 1041408   ;;  %vm28_vm2 = vcmask 64512   ;;  %vm51_vm3 = vcmask 31744   ;;  %s211_s0 = inlined_call_operand.vmem [shape: bf16[8,30], index: 0, kind: input, shape index: {}]   ;;  %s212_s2 = inlined_call_operand.vmem [shape: bf16[4,30], index: 2, kind: input, shape index: {}]   ;;  %s213_s1 = inlined_call_operand.vmem [shape: bf16[8,8], index: 1, kind: input, shape index: {}]   ;;  %s214_s3 = inlined_call_operand.vmem [shape: bf16[8,4], index: 3, kind: input, shape index: {}]   ;;  %s215_s4 = inlined_call_operand.vmem [shape: f32[8,1], index: 4, kind: input, shape index: {}]   ;;  %s216_s5 = inlined_call_operand.vmem [shape: f32[8,1], index: 5, kind: input, shape index: {}]   ;;  %s217_s6 = inlined_call_operand.vmem [shape: f32[8,30], index: 6, kind: output, shape index: {0}]   ;;  %s218_s7 = inlined_call_operand.vmem [shape: f32[8,30], index: 7, kind: output, shape index: {1}]  }
   0x1   :  { %v27_v0 = vld [vmem:[%s211_s0] sm:$0xf]  ;;  %vm72_vm4 = vcmask 244736   ;;  %v140_v22 = vmov 0  }
   0x2   :  { %v50_v1 = vld [vmem:[%s212_s2] sm:$0x3]  ;;  %v34_v2 = vsel %vm32_vm0, %v27_v0, 0  ;;  %136 = vset.pattern.permute.xlu2 %v140_v22  ;;  %137 = vset.pattern.permute.xlu0 %v140_v22 }
   0x3   :  { %v57_v3 = vsel %vm55_vm1, %v50_v1, 0  ;;  %43 = vmatpush.bf16.msra.mxu0 %v34_v2  ;;  %v26_v4 = vld [vmem:[%s213_s1] sm:$0xf] }
   0x4   :  { %66 = vmatpush.bf16.msra.mxu1 %v57_v3  ;;  %v49_v5 = vld [vmem:[%s214_s3] sm:$0xf] }
   0x5   :  { %v93_v33 = vld [vmem:[%s215_s4] sm:$0xff] }
   0x6   :  { %133 = vmatmul.msk.bf16.vlgmr.msra.gmra.mxu0 %vm28_vm2, %v26_v4  ;;  %v112_v37 = vld [vmem:[%s216_s5] sm:$0xff] }
   0x7   :  { %134 = vmatmul.msk.bf16.vlgmr.msra.gmra.mxu1 %vm51_vm3, %v49_v5 }
  0x83   :  { %v45_v6 = vpop.f32.mrf.mxu0 }
  0x84   :  { %v68_v7 = vpop.f32.mrf.mxu1  ;;  %v73_v8 = vsel %vm72_vm4, %v45_v6, 0.0 }
  0x85   :  { %74 = vadd.xlane.f32.xlu0 %v73_v8  ;;  %v76_v9 = vsel %vm72_vm4, %v68_v7, 0.0 }
  0x8b   :  { %v47_v10 = vpop.f32.mrf.mxu0 }
  0x8c   :  { %v70_v11 = vpop.f32.mrf.mxu1 }
  0x8d   :  { %77 = vadd.xlane.f32.xlu0 %v76_v9 }
  0xf8   :  { %v75_v12 = vpop.xlane.xlu0 %74 }
 0x100   :  { %v78_v13 = vpop.xlane.xlu0 %77 }
 0x101   :  { %v79_v14 = vadd.f32 %v78_v13, %v75_v12 }
 0x103   :  { %v80_v15 = vmul.f32 0.016666668, %v79_v14 }
 0x105   :  { %v81_v16 = vsub.f32 %v45_v6, %v80_v15  ;;  %v82_v18 = vsub.f32 %v68_v7, %v80_v15 }
 0x107   :  { %v83_v17 = vmul.f32 %v81_v16, %v81_v16  ;;  %v87_v20 = vmul.f32 %v82_v18, %v82_v18 }
 0x109   :  { %v84_v19 = vsel %vm72_vm4, %v83_v17, 0.0  ;;  %v88_v21 = vsel %vm72_vm4, %v87_v20, 0.0 }
 0x10a   :  { %85 = vadd.xlane.f32.xlu1 %v84_v19 }
 0x112   :  { %89 = vadd.xlane.f32.xlu1 %v88_v21 }
 0x17d   :  { %v86_v23 = vpop.xlane.xlu1 %85 }
 0x185   :  { %v90_v24 = vpop.xlane.xlu1 %89 }
 0x186   :  { %v91_v25 = vadd.f32 %v90_v24, %v86_v23 }
 0x188   :  { %v92_v26 = vmul.f32 0.016666668, %v91_v25 }
 0x18a   :  { %v94_v27 = vadd.f32 1e-05, %v92_v26 }
 0x18c   :  { %138 = vrsqrt.f32 %v94_v27  ;;  %vm101_vm6 = vweird.f32 %v94_v27 }
 0x192   :  { %v139_v28 = vpop.eup %138 }
 0x193   :  { %v96_v29 = vmul.f32 %v139_v28, %v94_v27  ;;  %vm102_vm5 = vweird.f32 %v139_v28 }
 0x194   :  { %vm103_vm7 = vmor %vm101_vm6, %vm102_vm5 }
 0x195   :  { %v97_v30 = vmul.f32 %v139_v28, %v96_v29 }
 0x197   :  { %v98_v31 = vmul.f32 0.5, %v97_v30 }
 0x199   :  { %v99_v32 = vsub.f32 1.5, %v98_v31 }
 0x19b   :  { %v100_v34 = vmul.f32 %v139_v28, %v99_v32 }
 0x19d   :  { %v104_v35 = vsel %vm103_vm7, %v139_v28, %v100_v34 }
 0x19e   :  { %v105_v36 = vmul.f32 %v104_v35, %v93_v33 }
 0x1a0   :  { %108 = vperm.xlu2 %136, %v105_v36  }
 0x1a8   :  { %115 = vperm.xlu2 %136, %v112_v37  }
 0x1fa   :  { %v109_v38 = vpop.permute.xlu2 %108 }
 0x1fb   :  { %v111_v39 = vmul.f32 %v109_v38, %v81_v16  ;;  %v119_v40 = vmul.f32 %v109_v38, %v82_v18 }
 0x202   :  { %v116_v41 = vpop.permute.xlu2 %115 }
 0x203   :  { %v118_v42 = vadd.f32 %v116_v41, %v111_v39  ;;  %v120_v43 = vadd.f32 %v119_v40, %v116_v41 }
 0x205   :  { %v121_v44 = vmax.f32 %v118_v42, 0.0  ;;  %v122_v45 = vmax.f32 %v120_v43, 0.0 }
 0x207   :  { %123 = vst.msk [vmem:[%s217_s6] sm:$0xff] %vm72_vm4, %v121_v44 }
 0x208   :  { %124 = vst.msk [vmem:[%s218_s7] sm:$0xff] %vm72_vm4, %v122_v45 }

</bundles_post_ra>
